<compile_context>
chip_gen: v6e
topology: v6e:2x2x1
jax: 0.10.0
libtpu: 0.0.40
codegen_flags: <defaults>
</compile_context>

<pallas_src>
import functools

import jax
import jax.numpy as jnp
from jax import lax
from jax.experimental import pallas as pl
from jax.experimental.pallas import tpu as pltpu

# --- hyperparameters (mirroring the PyTorch module) ---
block_size = 8
head_size_global = 16           # reference scales by the *global* head_size (=16)
n_embd = 32
num_heads = 4
per_head = n_embd // num_heads  # 8
vocab_size = 65                 # synthetic "len(chars)" (text not provided)

VOCAB_PAD = 128                 # lane-dense padded vocab width (output / lm_head)
TOK_PAD = 128                   # padded token-table rows in the combined embedding table
EMB_ROWS = TOK_PAD + block_size  # rows [0,128) tokens (zero padded), [128,136) positions


def gpt_kernel(idx_ref, emb_ref, wqkv_ref, bqkv_ref, wlm_ref, blm_ref,
               o_ref, attn_ref, *, seq_len):
    """One invocation over the whole flattened (B*T) activation slab:
       fused embedding lookup (one-hot matmul), fused QKV projection, per-head causal
       attention with an additive block-diagonal+causal mask, single K=32 lm_head."""
    n_rows = o_ref.shape[0]
    pow2 = (seq_len & (seq_len - 1)) == 0  # static Python bool

    # ---- fused token + position embedding via a single one-hot matmul ----
    idx_col = idx_ref[...]                                        # (n_rows, 1) int32
    row_id = lax.broadcasted_iota(jnp.int32, (n_rows, 1), 0)      # flat row index
    pos_col = (row_id & (seq_len - 1)) if pow2 else (row_id % seq_len)
    col = lax.broadcasted_iota(jnp.int32, (n_rows, EMB_ROWS), 1)
    onehot = ((col == idx_col) | (col == TOK_PAD + pos_col)).astype(jnp.float32)
    x = jnp.dot(onehot, emb_ref[...], preferred_element_type=jnp.float32)   # (n_rows, C)

    # ---- fused QKV projection: (B*T, C) @ (C, 3C) + bias ----
    qkv = jnp.dot(x, wqkv_ref[...], preferred_element_type=jnp.float32) + bqkv_ref[...]

    # ---- additive block-diagonal (same batch row) + causal mask, built once ----
    r = lax.broadcasted_iota(jnp.int32, (n_rows, n_rows), 0)
    c = lax.broadcasted_iota(jnp.int32, (n_rows, n_rows), 1)
    if pow2:
        shift = seq_len.bit_length() - 1
        same_batch = (r >> shift) == (c >> shift)
    else:
        same_batch = (r // seq_len) == (c // seq_len)
    mask_add = jnp.where(same_batch & (c <= r), jnp.float32(0.0), jnp.float32(-1e30))

    scale = jnp.float32(head_size_global ** -0.5)   # == 16**-0.5, as in the reference
    dn = (((1,), (1,)), ((), ()))                   # contract last dims: q @ k^T, no k.T

    for h in range(num_heads):                      # statically unrolled (num_heads = 4)
        q = qkv[:, h * per_head:(h + 1) * per_head]
        k = qkv[:, n_embd + h * per_head:n_embd + (h + 1) * per_head]
        v = qkv[:, 2 * n_embd + h * per_head:2 * n_embd + (h + 1) * per_head]

        wei = lax.dot_general(q, k, dn, preferred_element_type=jnp.float32) * scale
        wei = wei + mask_add                                             # masked_fill
        wei = wei - jnp.max(wei, axis=-1, keepdims=True)                 # softmax
        p = jnp.exp(wei)
        p = p * pl.reciprocal(jnp.sum(p, axis=-1, keepdims=True), approx=True)

        # "concat" on the lane axis by storing head_out at lane offset h*8
        attn_ref[:, h * per_head:(h + 1) * per_head] = jnp.dot(
            p, v, preferred_element_type=jnp.float32)                    # (B*T, 8)

    # ---- single K=32 lm_head matmul + bias, lane-dense 128-wide unmasked store ----
    o_ref[...] = (jnp.dot(attn_ref[...], wlm_ref[...],
                          preferred_element_type=jnp.float32) + blm_ref[...])


def gpt_forward(idx, params):
    """Forward pass (targets=None path): returns (logits, None)."""
    B, T = idx.shape
    assert T <= block_size

    idx2d = idx.reshape(B * T, 1).astype(jnp.int32)   # tiny; embedding gather is in-kernel

    logits_pad = pl.pallas_call(
        functools.partial(gpt_kernel, seq_len=T),
        out_shape=jax.ShapeDtypeStruct((B * T, VOCAB_PAD), jnp.float32),
        scratch_shapes=[pltpu.VMEM((B * T, n_embd), jnp.float32)],
    )(idx2d, params["emb_table"], params["w_qkv"], params["b_qkv"],
      params["w_lm_pad"], params["b_lm_pad"])

    # Padded columns carry -1e30, so `logits_pad` is directly consumable (softmax/argmax)
    # by a fused downstream kernel; slice only to preserve the reference (B, T, vocab) API.
    logits = logits_pad[:, :vocab_size].reshape(B, T, vocab_size)
    return logits, None


def init_params(key):
    """Deterministic synthetic parameters mirroring the nn.Module shapes.
    nn.Linear weights stored transposed (in, out); per-head q/k/v weights fused into one
    (C, 3C) matrix; token + position embeddings fused into one (136, C) lookup table;
    lm_head zero-padded to a 128-wide lane-dense tile with -1e30 bias in pad columns."""
    ks = jax.random.split(key, 16)

    def linear(kw, kb, fan_in, fan_out):
        bound = 1.0 / jnp.sqrt(fan_in)
        w = jax.random.uniform(kw, (fan_in, fan_out), jnp.float32, -bound, bound)
        b = jax.random.uniform(kb, (fan_out,), jnp.float32, -bound, bound)
        return w, b

    wq_l, bq_l, wk_l, bk_l, wv_l, bv_l = [], [], [], [], [], []
    for h in range(num_heads):
        kh = jax.random.split(ks[h], 6)
        wq, bq = linear(kh[0], kh[1], n_embd, per_head)
        wk, bk = linear(kh[2], kh[3], n_embd, per_head)
        wv, bv = linear(kh[4], kh[5], n_embd, per_head)
        wq_l.append(wq); bq_l.append(bq)
        wk_l.append(wk); bk_l.append(bk)
        wv_l.append(wv); bv_l.append(bv)

    # fused QKV: output axis laid out as [Q heads | K heads | V heads], each head 8 wide
    w_qkv = jnp.concatenate(wq_l + wk_l + wv_l, axis=1)                   # (32, 96)
    b_qkv = jnp.concatenate(bq_l + bk_l + bv_l).reshape(1, 3 * n_embd)    # (1, 96)

    w_lm, b_lm = linear(ks[10], ks[11], n_embd, vocab_size)
    w_lm_pad = jnp.zeros((n_embd, VOCAB_PAD), jnp.float32).at[:, :vocab_size].set(w_lm)
    b_lm_pad = jnp.full((1, VOCAB_PAD), -1e30, jnp.float32).at[:, :vocab_size].set(b_lm)

    tok_emb = jax.random.normal(ks[12], (vocab_size, n_embd), jnp.float32)
    pos_emb = jax.random.normal(ks[13], (block_size, n_embd), jnp.float32)

    # combined lookup table: rows [0, 128) = zero-padded token table, rows [128, 136) = pos
    emb_table = jnp.zeros((EMB_ROWS, n_embd), jnp.float32)
    emb_table = emb_table.at[:vocab_size].set(tok_emb)
    emb_table = emb_table.at[TOK_PAD:TOK_PAD + block_size].set(pos_emb)

    return {
        "emb_table": emb_table,
        "w_qkv": w_qkv, "b_qkv": b_qkv,
        "w_lm_pad": w_lm_pad, "b_lm_pad": b_lm_pad,
    }


if __name__ == "__main__":
    key = jax.random.PRNGKey(0)
    pkey, ikey = jax.random.split(key)
    params = init_params(pkey)

    B, T = 2, block_size
    idx = jax.random.randint(ikey, (B, T), 0, vocab_size, dtype=jnp.int32)

    logits, loss = gpt_forward(idx, params)
    logits = jax.block_until_ready(logits)

    assert logits.shape == (B, T, vocab_size)
    assert bool(jnp.all(jnp.isfinite(logits)))
    assert loss is None
    print("KERNEL_OK")
</pallas_src>

<mosaic_0001>
module attributes {stable_mosaic.version = 11 : i64} {
  func.func @gpt_kernel(%arg0: memref<16x1xi32, #tpu.memory_space<vmem>>, %arg1: memref<136x32xf32, #tpu.memory_space<vmem>>, %arg2: memref<32x96xf32, #tpu.memory_space<vmem>>, %arg3: memref<1x96xf32, #tpu.memory_space<vmem>>, %arg4: memref<32x128xf32, #tpu.memory_space<vmem>>, %arg5: memref<1x128xf32, #tpu.memory_space<vmem>>, %arg6: memref<16x128xf32, #tpu.memory_space<vmem>>, %arg7: memref<16x32xf32, #tpu.memory_space<vmem>>) attributes {dimension_semantics = [], scalar_prefetch = 0 : i64, scratch_operands = 1 : i64, tpu.core_type = #tpu.core_type<tc>} {
    %c0 = arith.constant 0 : index
    %c0_0 = arith.constant 0 : index
    %0 = vector.load %arg0[%c0, %c0_0] : memref<16x1xi32, #tpu.memory_space<vmem>>, vector<16x1xi32>
    %1 = tpu.iota {dimensions = array<i32: 0>} : vector<16x1xi32>
    %c7_i32 = arith.constant 7 : i32
    %2 = vector.broadcast %c7_i32 : i32 to vector<16x1xi32>
    %3 = arith.andi %1, %2 : vector<16x1xi32>
    %4 = tpu.iota {dimensions = array<i32: 1>} : vector<16x136xi32>
    %5 = vector.broadcast %0 : vector<16x1xi32> to vector<16x136xi32>
    %6 = arith.cmpi eq, %4, %5 : vector<16x136xi32>
    %c128_i32 = arith.constant 128 : i32
    %7 = vector.broadcast %c128_i32 : i32 to vector<16x1xi32>
    %8 = arith.addi %7, %3 : vector<16x1xi32>
    %9 = vector.broadcast %8 : vector<16x1xi32> to vector<16x136xi32>
    %10 = arith.cmpi eq, %4, %9 : vector<16x136xi32>
    %11 = arith.ori %6, %10 : vector<16x136xi1>
    %12 = arith.extui %11 : vector<16x136xi1> to vector<16x136xi32>
    %13 = arith.sitofp %12 : vector<16x136xi32> to vector<16x136xf32>
    %c0_1 = arith.constant 0 : index
    %c0_2 = arith.constant 0 : index
    %14 = vector.load %arg1[%c0_1, %c0_2] : memref<136x32xf32, #tpu.memory_space<vmem>>, vector<136x32xf32>
    %cst = arith.constant dense<0.000000e+00> : vector<16x32xf32>
    %15 = tpu.matmul %13, %14, %cst {dimension_numbers = #tpu.dot_dimension_numbers<[1], [0], [0], [1], [0, 0, 1, 1], [], []>} : vector<16x136xf32>, vector<136x32xf32>, vector<16x32xf32> -> vector<16x32xf32>
    %c0_3 = arith.constant 0 : index
    %c0_4 = arith.constant 0 : index
    %16 = vector.load %arg2[%c0_3, %c0_4] : memref<32x96xf32, #tpu.memory_space<vmem>>, vector<32x96xf32>
    %cst_5 = arith.constant dense<0.000000e+00> : vector<16x96xf32>
    %17 = tpu.matmul %15, %16, %cst_5 {dimension_numbers = #tpu.dot_dimension_numbers<[1], [0], [0], [1], [0, 0, 1, 1], [], []>} : vector<16x32xf32>, vector<32x96xf32>, vector<16x96xf32> -> vector<16x96xf32>
    %c0_6 = arith.constant 0 : index
    %c0_7 = arith.constant 0 : index
    %18 = vector.load %arg3[%c0_6, %c0_7] : memref<1x96xf32, #tpu.memory_space<vmem>>, vector<1x96xf32>
    %19 = vector.broadcast %18 : vector<1x96xf32> to vector<16x96xf32>
    %20 = arith.addf %17, %19 : vector<16x96xf32>
    %21 = tpu.iota {dimensions = array<i32: 0>} : vector<16x16xi32>
    %22 = tpu.iota {dimensions = array<i32: 1>} : vector<16x16xi32>
    %c3_i32 = arith.constant 3 : i32
    %23 = vector.broadcast %c3_i32 : i32 to vector<16x16xi32>
    %24 = arith.shrsi %21, %23 : vector<16x16xi32>
    %c3_i32_8 = arith.constant 3 : i32
    %25 = vector.broadcast %c3_i32_8 : i32 to vector<16x16xi32>
    %26 = arith.shrsi %22, %25 : vector<16x16xi32>
    %27 = arith.cmpi eq, %24, %26 : vector<16x16xi32>
    %28 = arith.cmpi sle, %22, %21 : vector<16x16xi32>
    %29 = arith.andi %27, %28 : vector<16x16xi1>
    %cst_9 = arith.constant 0.000000e+00 : f32
    %cst_10 = arith.constant -1.000000e+30 : f32
    %30 = vector.broadcast %cst_9 : f32 to vector<16x16xf32>
    %31 = vector.broadcast %cst_10 : f32 to vector<16x16xf32>
    %32 = arith.select %29, %30, %31 : vector<16x16xi1>, vector<16x16xf32>
    %33 = vector.extract_strided_slice %20 {offsets = [0, 0], sizes = [16, 8], strides = [1, 1]} : vector<16x96xf32> to vector<16x8xf32>
    %34 = vector.extract_strided_slice %20 {offsets = [0, 32], sizes = [16, 8], strides = [1, 1]} : vector<16x96xf32> to vector<16x8xf32>
    %35 = vector.extract_strided_slice %20 {offsets = [0, 64], sizes = [16, 8], strides = [1, 1]} : vector<16x96xf32> to vector<16x8xf32>
    %cst_11 = arith.constant dense<0.000000e+00> : vector<16x16xf32>
    %36 = tpu.matmul %33, %34, %cst_11 {dimension_numbers = #tpu.dot_dimension_numbers<[1], [1], [0], [0], [0, 0, 1, 0], [], []>} : vector<16x8xf32>, vector<16x8xf32>, vector<16x16xf32> -> vector<16x16xf32>
    %cst_12 = arith.constant 2.500000e-01 : f32
    %37 = vector.broadcast %cst_12 : f32 to vector<16x16xf32>
    %38 = arith.mulf %36, %37 : vector<16x16xf32>
    %39 = arith.addf %38, %32 : vector<16x16xf32>
    %cst_13 = arith.constant dense<0xFF800000> : vector<16xf32>
    %40 = vector.multi_reduction <maximumf>, %39, %cst_13 [1] : vector<16x16xf32> to vector<16xf32>
    %41 = vector.shape_cast %40 : vector<16xf32> to vector<16x1xf32>
    %42 = vector.broadcast %41 : vector<16x1xf32> to vector<16x16xf32>
    %43 = arith.subf %39, %42 : vector<16x16xf32>
    %44 = math.exp %43 : vector<16x16xf32>
    %cst_14 = arith.constant dense<0.000000e+00> : vector<16xf32>
    %45 = vector.multi_reduction <add>, %44, %cst_14 [1] : vector<16x16xf32> to vector<16xf32>
    %46 = vector.shape_cast %45 : vector<16xf32> to vector<16x1xf32>
    %47 = tpu.reciprocal %46 {approx = true} : vector<16x1xf32> -> vector<16x1xf32>
    %48 = vector.broadcast %47 : vector<16x1xf32> to vector<16x16xf32>
    %49 = arith.mulf %44, %48 : vector<16x16xf32>
    %cst_15 = arith.constant dense<0.000000e+00> : vector<16x8xf32>
    %50 = tpu.matmul %49, %35, %cst_15 {dimension_numbers = #tpu.dot_dimension_numbers<[1], [0], [0], [1], [0, 0, 1, 1], [], []>} : vector<16x16xf32>, vector<16x8xf32>, vector<16x8xf32> -> vector<16x8xf32>
    %c0_16 = arith.constant 0 : index
    %c0_17 = arith.constant 0 : index
    %51 = vector.load %arg7[%c0_16, %c0_17] : memref<16x32xf32, #tpu.memory_space<vmem>>, vector<16x8xf32>
    tpu.vector_store %arg7[%c0_16, %c0_17], %50 {strides = array<i32>} : memref<16x32xf32, #tpu.memory_space<vmem>>, vector<16x8xf32>,
    %52 = vector.extract_strided_slice %20 {offsets = [0, 8], sizes = [16, 8], strides = [1, 1]} : vector<16x96xf32> to vector<16x8xf32>
    %53 = vector.extract_strided_slice %20 {offsets = [0, 40], sizes = [16, 8], strides = [1, 1]} : vector<16x96xf32> to vector<16x8xf32>
    %54 = vector.extract_strided_slice %20 {offsets = [0, 72], sizes = [16, 8], strides = [1, 1]} : vector<16x96xf32> to vector<16x8xf32>
    %cst_18 = arith.constant dense<0.000000e+00> : vector<16x16xf32>
    %55 = tpu.matmul %52, %53, %cst_18 {dimension_numbers = #tpu.dot_dimension_numbers<[1], [1], [0], [0], [0, 0, 1, 0], [], []>} : vector<16x8xf32>, vector<16x8xf32>, vector<16x16xf32> -> vector<16x16xf32>
    %cst_19 = arith.constant 2.500000e-01 : f32
    %56 = vector.broadcast %cst_19 : f32 to vector<16x16xf32>
    %57 = arith.mulf %55, %56 : vector<16x16xf32>
    %58 = arith.addf %57, %32 : vector<16x16xf32>
    %cst_20 = arith.constant dense<0xFF800000> : vector<16xf32>
    %59 = vector.multi_reduction <maximumf>, %58, %cst_20 [1] : vector<16x16xf32> to vector<16xf32>
    %60 = vector.shape_cast %59 : vector<16xf32> to vector<16x1xf32>
    %61 = vector.broadcast %60 : vector<16x1xf32> to vector<16x16xf32>
    %62 = arith.subf %58, %61 : vector<16x16xf32>
    %63 = math.exp %62 : vector<16x16xf32>
    %cst_21 = arith.constant dense<0.000000e+00> : vector<16xf32>
    %64 = vector.multi_reduction <add>, %63, %cst_21 [1] : vector<16x16xf32> to vector<16xf32>
    %65 = vector.shape_cast %64 : vector<16xf32> to vector<16x1xf32>
    %66 = tpu.reciprocal %65 {approx = true} : vector<16x1xf32> -> vector<16x1xf32>
    %67 = vector.broadcast %66 : vector<16x1xf32> to vector<16x16xf32>
    %68 = arith.mulf %63, %67 : vector<16x16xf32>
    %cst_22 = arith.constant dense<0.000000e+00> : vector<16x8xf32>
    %69 = tpu.matmul %68, %54, %cst_22 {dimension_numbers = #tpu.dot_dimension_numbers<[1], [0], [0], [1], [0, 0, 1, 1], [], []>} : vector<16x16xf32>, vector<16x8xf32>, vector<16x8xf32> -> vector<16x8xf32>
    %c0_23 = arith.constant 0 : index
    %c8 = arith.constant 8 : index
    %70 = vector.load %arg7[%c0_23, %c8] : memref<16x32xf32, #tpu.memory_space<vmem>>, vector<16x8xf32>
    tpu.vector_store %arg7[%c0_23, %c8], %69 {strides = array<i32>} : memref<16x32xf32, #tpu.memory_space<vmem>>, vector<16x8xf32>,
    %71 = vector.extract_strided_slice %20 {offsets = [0, 16], sizes = [16, 8], strides = [1, 1]} : vector<16x96xf32> to vector<16x8xf32>
    %72 = vector.extract_strided_slice %20 {offsets = [0, 48], sizes = [16, 8], strides = [1, 1]} : vector<16x96xf32> to vector<16x8xf32>
    %73 = vector.extract_strided_slice %20 {offsets = [0, 80], sizes = [16, 8], strides = [1, 1]} : vector<16x96xf32> to vector<16x8xf32>
    %cst_24 = arith.constant dense<0.000000e+00> : vector<16x16xf32>
    %74 = tpu.matmul %71, %72, %cst_24 {dimension_numbers = #tpu.dot_dimension_numbers<[1], [1], [0], [0], [0, 0, 1, 0], [], []>} : vector<16x8xf32>, vector<16x8xf32>, vector<16x16xf32> -> vector<16x16xf32>
    %cst_25 = arith.constant 2.500000e-01 : f32
    %75 = vector.broadcast %cst_25 : f32 to vector<16x16xf32>
    %76 = arith.mulf %74, %75 : vector<16x16xf32>
    %77 = arith.addf %76, %32 : vector<16x16xf32>
    %cst_26 = arith.constant dense<0xFF800000> : vector<16xf32>
    %78 = vector.multi_reduction <maximumf>, %77, %cst_26 [1] : vector<16x16xf32> to vector<16xf32>
    %79 = vector.shape_cast %78 : vector<16xf32> to vector<16x1xf32>
    %80 = vector.broadcast %79 : vector<16x1xf32> to vector<16x16xf32>
    %81 = arith.subf %77, %80 : vector<16x16xf32>
    %82 = math.exp %81 : vector<16x16xf32>
    %cst_27 = arith.constant dense<0.000000e+00> : vector<16xf32>
    %83 = vector.multi_reduction <add>, %82, %cst_27 [1] : vector<16x16xf32> to vector<16xf32>
    %84 = vector.shape_cast %83 : vector<16xf32> to vector<16x1xf32>
    %85 = tpu.reciprocal %84 {approx = true} : vector<16x1xf32> -> vector<16x1xf32>
    %86 = vector.broadcast %85 : vector<16x1xf32> to vector<16x16xf32>
    %87 = arith.mulf %82, %86 : vector<16x16xf32>
    %cst_28 = arith.constant dense<0.000000e+00> : vector<16x8xf32>
    %88 = tpu.matmul %87, %73, %cst_28 {dimension_numbers = #tpu.dot_dimension_numbers<[1], [0], [0], [1], [0, 0, 1, 1], [], []>} : vector<16x16xf32>, vector<16x8xf32>, vector<16x8xf32> -> vector<16x8xf32>
    %c0_29 = arith.constant 0 : index
    %c16 = arith.constant 16 : index
    %89 = vector.load %arg7[%c0_29, %c16] : memref<16x32xf32, #tpu.memory_space<vmem>>, vector<16x8xf32>
    tpu.vector_store %arg7[%c0_29, %c16], %88 {strides = array<i32>} : memref<16x32xf32, #tpu.memory_space<vmem>>, vector<16x8xf32>,
    %90 = vector.extract_strided_slice %20 {offsets = [0, 24], sizes = [16, 8], strides = [1, 1]} : vector<16x96xf32> to vector<16x8xf32>
    %91 = vector.extract_strided_slice %20 {offsets = [0, 56], sizes = [16, 8], strides = [1, 1]} : vector<16x96xf32> to vector<16x8xf32>
    %92 = vector.extract_strided_slice %20 {offsets = [0, 88], sizes = [16, 8], strides = [1, 1]} : vector<16x96xf32> to vector<16x8xf32>
    %cst_30 = arith.constant dense<0.000000e+00> : vector<16x16xf32>
    %93 = tpu.matmul %90, %91, %cst_30 {dimension_numbers = #tpu.dot_dimension_numbers<[1], [1], [0], [0], [0, 0, 1, 0], [], []>} : vector<16x8xf32>, vector<16x8xf32>, vector<16x16xf32> -> vector<16x16xf32>
    %cst_31 = arith.constant 2.500000e-01 : f32
    %94 = vector.broadcast %cst_31 : f32 to vector<16x16xf32>
    %95 = arith.mulf %93, %94 : vector<16x16xf32>
    %96 = arith.addf %95, %32 : vector<16x16xf32>
    %cst_32 = arith.constant dense<0xFF800000> : vector<16xf32>
    %97 = vector.multi_reduction <maximumf>, %96, %cst_32 [1] : vector<16x16xf32> to vector<16xf32>
    %98 = vector.shape_cast %97 : vector<16xf32> to vector<16x1xf32>
    %99 = vector.broadcast %98 : vector<16x1xf32> to vector<16x16xf32>
    %100 = arith.subf %96, %99 : vector<16x16xf32>
    %101 = math.exp %100 : vector<16x16xf32>
    %cst_33 = arith.constant dense<0.000000e+00> : vector<16xf32>
    %102 = vector.multi_reduction <add>, %101, %cst_33 [1] : vector<16x16xf32> to vector<16xf32>
    %103 = vector.shape_cast %102 : vector<16xf32> to vector<16x1xf32>
    %104 = tpu.reciprocal %103 {approx = true} : vector<16x1xf32> -> vector<16x1xf32>
    %105 = vector.broadcast %104 : vector<16x1xf32> to vector<16x16xf32>
    %106 = arith.mulf %101, %105 : vector<16x16xf32>
    %cst_34 = arith.constant dense<0.000000e+00> : vector<16x8xf32>
    %107 = tpu.matmul %106, %92, %cst_34 {dimension_numbers = #tpu.dot_dimension_numbers<[1], [0], [0], [1], [0, 0, 1, 1], [], []>} : vector<16x16xf32>, vector<16x8xf32>, vector<16x8xf32> -> vector<16x8xf32>
    %c0_35 = arith.constant 0 : index
    %c24 = arith.constant 24 : index
    %108 = vector.load %arg7[%c0_35, %c24] : memref<16x32xf32, #tpu.memory_space<vmem>>, vector<16x8xf32>
    tpu.vector_store %arg7[%c0_35, %c24], %107 {strides = array<i32>} : memref<16x32xf32, #tpu.memory_space<vmem>>, vector<16x8xf32>,
    %c0_36 = arith.constant 0 : index
    %c0_37 = arith.constant 0 : index
    %109 = vector.load %arg7[%c0_36, %c0_37] : memref<16x32xf32, #tpu.memory_space<vmem>>, vector<16x32xf32>
    %c0_38 = arith.constant 0 : index
    %c0_39 = arith.constant 0 : index
    %110 = vector.load %arg4[%c0_38, %c0_39] : memref<32x128xf32, #tpu.memory_space<vmem>>, vector<32x128xf32>
    %cst_40 = arith.constant dense<0.000000e+00> : vector<16x128xf32>
    %111 = tpu.matmul %109, %110, %cst_40 {dimension_numbers = #tpu.dot_dimension_numbers<[1], [0], [0], [1], [0, 0, 1, 1], [], []>} : vector<16x32xf32>, vector<32x128xf32>, vector<16x128xf32> -> vector<16x128xf32>
    %c0_41 = arith.constant 0 : index
    %c0_42 = arith.constant 0 : index
    %112 = vector.load %arg5[%c0_41, %c0_42] : memref<1x128xf32, #tpu.memory_space<vmem>>, vector<1x128xf32>
    %113 = vector.broadcast %112 : vector<1x128xf32> to vector<16x128xf32>
    %114 = arith.addf %111, %113 : vector<16x128xf32>
    %c0_43 = arith.constant 0 : index
    %c0_44 = arith.constant 0 : index
    %115 = vector.load %arg6[%c0_43, %c0_44] : memref<16x128xf32, #tpu.memory_space<vmem>>, vector<16x128xf32>
    tpu.vector_store %arg6[%c0_43, %c0_44], %114 {strides = array<i32>} : memref<16x128xf32, #tpu.memory_space<vmem>>, vector<16x128xf32>,
    return
  }
}

</mosaic_0001>

<bundles_post_ra>
// kernel: tpu_custom_call.1
= control target key start
LH: loop header
LB: loop body
LE: loop exit
PB: predicated region body
PF: predicated region fallthrough
CT: control target
= control target key end

     0   :  { %v1462_v2 = vmov 0   ;;  %v1463_v3 = vmov 0.0   ;;  %s1741_s0 = inlined_call_operand.vmem [shape: s32[16,1], index: 0, kind: input, shape index: {}]   ;;  %s1742_s1 = inlined_call_operand.vmem [shape: f32[136,32], index: 1, kind: input, shape index: {}]   ;;  %s1743_s2 = inlined_call_operand.vmem [shape: f32[32,96], index: 2, kind: input, shape index: {}]   ;;  %s1744_s3 = inlined_call_operand.vmem [shape: f32[1,96], index: 3, kind: input, shape index: {}]   ;;  %s1745_s4 = inlined_call_operand.vmem [shape: f32[32,128], index: 4, kind: input, shape index: {}]   ;;  %s1746_s5 = inlined_call_operand.vmem [shape: f32[1,128], index: 5, kind: input, shape index: {}]   ;;  %s1747_s6 = inlined_call_operand.hbm [shape: f32[16,128], index: 6, kind: output, shape index: {}]  }
   0x1   :  { %v24_v0 = vld [vmem:[%s1741_s0] sm:$0xff]  ;;  %v77_v1 = vld [vmem:[%s1742_s1 + $0x78] sm:$0xff]  ;;  %1407 = vset.pattern.permute.xlu0 %v1462_v2  ;;  %86 = vmatprep.subr.mxu0 %v1463_v3  ;;  %v76_v4 = vld [vmem:[%s1742_s1 + $0x70] sm:$0xff] }
   0x2   :  { %35 = vperm.xlu0 %1407, %v24_v0   ;;  %87 = vmatpush1.msra.mxu0 %v77_v1  ;;  %v25_v5 = vld [vmem:[%s1741_s0 + $0x8] sm:$0xff]  ;;  %v74_v7 = vld [vmem:[%s1742_s1 + $0x60] sm:$0xff]  ;;  %v164_v8 = vld [vmem:[%s1743_s2 + $0x18] sm:$0xff] }
   0x3   :  { %88 = vmatprep.subr.mxu0 %v1463_v3  ;;  %v75_v6 = vld [vmem:[%s1742_s1 + $0x68] sm:$0xff]  ;;  %v163_v9 = vld [vmem:[%s1743_s2 + $0x10] sm:$0xff]  ;;  %v73_v10 = vld [vmem:[%s1742_s1 + $0x58] sm:$0xff]  ;;  %1309 = vmatprep.subr.mxu1 %v164_v8 }
   0x4   :  { %89 = vmatpush1.msra.mxu0 %v76_v4 }
   0x5   :  { %90 = vmatprep.subr.mxu0 %v1463_v3 }
   0x6   :  { %38 = vperm.xlu0 %1407, %v25_v5   ;;  %91 = vmatpush1.msra.mxu0 %v75_v6 }
   0x7   :  { %92 = vmatprep.subr.mxu0 %v1463_v3 }
   0x8   :  { %11 = vsyncpa [#allocation4], 0  ;;  %93 = vmatpush1.msra.mxu0 %v74_v7  ;;  %1310 = vmatpush3.msra.mxu1 %v164_v8  ;;  %v72_v11 = vld [vmem:[%s1742_s1 + $0x50] sm:$0xff]  ;;  %v71_v12 = vld [vmem:[%s1742_s1 + $0x48] sm:$0xff]  ;;  %v26_v23 = vlaneseq  ;;  %vm79_vm2 = vcmask 64512   ;;  %v1464_v35 = vmov 1.0  }
   0x9   :  { %94 = vmatprep.subr.mxu0 %v1463_v3  ;;  %1311 = vmatprep.subr.mxu1 %v163_v9  ;;  %v70_v13 = vld [vmem:[%s1742_s1 + $0x40] sm:$0xff]  ;;  %v69_v14 = vld [vmem:[%s1742_s1 + $0x38] sm:$0xff]  ;;  %v68_v15 = vld [vmem:[%s1742_s1 + $0x30] sm:$0xff]  ;;  %vm172_vm9 = vcmask 261120   ;;  %v1466_v54 = vmov -1e+30  }
   0xa   :  { %95 = vmatpush1.msra.mxu0 %v73_v10  ;;  %1312 = vmatpush3.msra.mxu1 %v163_v9  ;;  %v67_v16 = vld [vmem:[%s1742_s1 + $0x28] sm:$0xff]  ;;  %v66_v17 = vld [vmem:[%s1742_s1 + $0x20] sm:$0xff]  ;;  %v65_v18 = vld [vmem:[%s1742_s1 + $0x18] sm:$0xff]  ;;  %v1597_v24 = vshrl.u32 %v26_v23, 7  ;;  %v32_v25 = vand.u32 127, %v26_v23  ;;  %s1468_s18 = smov 88  }
   0xb   :  { %96 = vmatprep.subr.mxu0 %v1463_v3  ;;  %v64_v19 = vld [vmem:[%s1742_s1 + $0x10] sm:$0xff]  ;;  %v63_v20 = vld [vmem:[%s1742_s1 + $0x8] sm:$0xff]  ;;  %v62_v21 = vld [vmem:[%s1742_s1] sm:$0xff]  ;;  %s1469_s19 = smov 120   ;;  %s1470_s20 = smov 56  }
   0xc   :  { %97 = vmatpush1.msra.mxu0 %v72_v11  ;;  %v78_v22 = vld [vmem:[%s1742_s1 + $0x80] sm:$0xff]  ;;  %v29_v26 = vand.u32 7, %v1597_v24  ;;  %v28_v27 = vadd.s32 8, %v1597_v24  ;;  %v33_v28 = vadd.s32 128, %v32_v25  ;;  %v162_v37 = vld [vmem:[%s1743_s2 + $0x8] sm:$0xff]  ;;  %v256_v51 = vshra.s32 %v32_v25, 3 }
   0xd   :  { %98 = vmatprep.subr.mxu0 %v1463_v3  ;;  %1313 = vmatprep.subr.mxu1 %v162_v37  ;;  %v161_v38 = vld [vmem:[%s1743_s2] sm:$0xff]  ;;  %s1465_s2 = smov 96   ;;  %v254_v52 = vshra.s32 %v1597_v24, 3  ;;  %vm259_vm13 = vcmp.le.s32.totalorder %v32_v25, %v1597_v24  ;;  %s1471_s21 = smov 80  }
   0xe   :  { %99 = vmatpush1.msra.mxu0 %v71_v12  ;;  %v44_v29 = vadd.s32 128, %v29_v26  ;;  %v30_v30 = vand.u32 7, %v28_v27  ;;  %1314 = vmatpush3.msra.mxu1 %v162_v37  ;;  %v1235_v43 = vld [vmem:[%s1744_s3] ss:$0 sm:$0xff]  ;;  %v255_v50 = vshra.s32 %v28_v27, 3  ;;  %vm260_vm11 = vcmp.le.s32.totalorder %v32_v25, %v28_v27  ;;  %s1467_s3 = smov 64  }
   0xf   :  { %100 = vmatprep.subr.mxu0 %v1463_v3  ;;  %1315 = vmatprep.subr.mxu1 %v161_v38  ;;  %vm257_vm12 = vcmp.eq.s32.totalorder %v254_v52, %v256_v51  ;;  %s1472_s22 = smov 112   ;;  %s1473_s23 = smov 48  }
  0x10   :  { %101 = vmatpush1.msra.mxu0 %v70_v13  ;;  %vm47_vm0 = vcmp.eq.s32.totalorder %v33_v28, %v44_v29  ;;  %v45_v31 = vadd.s32 128, %v30_v30  ;;  %1316 = vmatpush3.msra.mxu1 %v161_v38  ;;  %vm258_vm10 = vcmp.eq.s32.totalorder %v255_v50, %v256_v51  ;;  %vm261_vm15 = vmand %vm257_vm12, %vm259_vm13  ;;  %s1474_s24 = smov 72   ;;  %s1475_s25 = smov 104  }
  0x11   :  { %102 = vmatprep.subr.mxu0 %v1463_v3  ;;  %vm262_vm14 = vmand %vm258_vm10, %vm260_vm11  ;;  %v1634_v58 = vsel %vm261_vm15, 0.0, %v1466_v54  ;;  %s1476_s26 = smov 40   ;;  %s1477_s27 = smov 8  }
  0x12   :  { %103 = vmatpush1.msra.mxu0 %v69_v14  ;;  %vm49_vm4 = vcmp.eq.s32.totalorder %v33_v28, %v45_v31  ;;  %v1632_v55 = vsel %vm262_vm14, 0.0, %v1466_v54  ;;  %s1478_s28 = smov 16   ;;  %s1479_s12 = smov 24  }
  0x13   :  { %104 = vmatprep.subr.mxu0 %v1463_v3  ;;  %s1480_s13 = smov [#allocation3]  }
  0x14   :  { %105 = vmatpush1.msra.mxu0 %v68_v15  ;;  %s1216_s14 = sshll.u32 %s1480_s13, 4  ;;  %s1217_s14 = int_to_ptr.vmem [resolvable:$true] %s1216_s14 }
  0x15   :  { %106 = vmatprep.subr.mxu0 %v1463_v3  ;;  %s1440_s15 = scalar_lea.vmem %s1217_s14, 256  ;;  %p1445_p1 = scmp.lt.s32.totalorder %s1217_s14, %s1217_s14 }
  0x16   :  { %107 = vmatpush1.msra.mxu0 %v67_v16  ;;  %p1441_p0 = scmp.ne.s32.totalorder %s1217_s14, %s1440_s15  ;;  %p1446_p2 = scmp.lt.s32.totalorder %s1440_s15, %s1440_s15 }
  0x17   :  { %108 = vmatprep.subr.mxu0 %v1463_v3 }
  0x18   :  { %109 = vmatpush1.msra.mxu0 %v66_v17  ;;  %p1447_p3 = por %p1446_p2, %p1445_p1 }
  0x19   :  { %110 = vmatprep.subr.mxu0 %v1463_v3 }
  0x1a   :  { %111 = vmatpush1.msra.mxu0 %v65_v18  ;;  %p1448_p4 = pnand %p1447_p3, %p1441_p0 }
  0x1b   :  { %112 = vmatprep.subr.mxu0 %v1463_v3 }
  0x1c   :  { %113 = vmatpush1.msra.mxu0 %v64_v19 }
  0x1d   :  { %114 = vmatprep.subr.mxu0 %v1463_v3 }
  0x1e   :  { %115 = vmatpush1.msra.mxu0 %v63_v20 }
  0x1f   :  { %116 = vmatprep.subr.mxu0 %v1463_v3 }
  0x20   :  { %117 = vmatpush1.msra.mxu0 %v62_v21 }
  0x21   :  { %148 = vmatprep.subr.mxu0 %v1463_v3 }
  0x22   :  { %149 = vmatpush2.msra.mxu0 %v78_v22 }
  0x7d   :  { %v36_v32 = vpop.permute.xlu0 %35 }
  0x7e   :  { %vm41_vm1 = vcmp.eq.s32.totalorder %v33_v28, %v36_v32  ;;  %vm40_vm5 = vcmp.eq.s32.totalorder %v32_v25, %v36_v32 }
  0x7f   :  { %vm51_vm3 = vmor %vm41_vm1, %vm47_vm0  ;;  %vm358_vm0 = vcmask 130048   ;;  %vm682_vm1 = vcmask 130112  }
  0x80   :  { %v1228_v33 = vsel %vm51_vm3, 1.0, %v1463_v3  ;;  %vm1112_vm3 = vcmask 261312  }
  0x81   :  { %1231 = vmatprep.mubr.msk.f32.mxu0 %vm79_vm2, %v1228_v33  ;;  %v39_v34 = vpop.permute.xlu0 %38 }
  0x82   :  { %vm43_vm6 = vcmp.eq.s32.totalorder %v33_v28, %v39_v34  ;;  %1232 = vmatmul.mubr.msk.f32.vlgmr.msra.gmra.mxu0 %vm40_vm5, %v1464_v35  ;;  %vm42_vm8 = vcmp.eq.s32.totalorder %v32_v25, %v39_v34 }
  0x83   :  { %vm53_vm7 = vmor %vm43_vm6, %vm49_vm4 }
  0x84   :  { %v1230_v36 = vsel %vm53_vm7, 1.0, %v1463_v3 }
  0x85   :  { %1233 = vmatprep.mubr.msk.f32.mxu0 %vm79_vm2, %v1230_v36 }
  0x86   :  { %1234 = vmatmul.mubr.msk.f32.gmra.mxu0 %vm42_vm8, %v1464_v35 }
 0x142   :  { %v152_v39 = vpop.f32.mrf.mxu0 }
 0x143   :  { %1317 = vmatprep.mubr.msk.f32.mxu1 %vm172_vm9, %v152_v39 }
 0x144   :  { %v154_v40 = vpop.f32.mrf.mxu0 }
 0x146   :  { %v157_v41 = vpop.f32.mrf.mxu0 }
 0x147   :  { %1318 = vmatmul.mubr.msk.f32.vlgmr.msra.gmra.mxu1 %vm172_vm9, %v157_v41 }
 0x148   :  { %v159_v42 = vpop.f32.mrf.mxu0 }
 0x207   :  { %v1319_v44 = vpop.f32.mrf.mxu1 }
 0x208   :  { %v1616_v45 = vadd.f32 %v1319_v44, %v1235_v43 }
 0x209   :  { %v245_v46 = vpop.f32.mrf.mxu1 }
 0x20a   :  { %v1618_v47 = vadd.f32 %v1235_v43, %v245_v46  ;;  %269 = vrot.lane.b32.xlu1 %v1616_v45, %s1465_s2 }
 0x20c   :  { %1324 = vmatprep.mubr.msk.f32.mxu1 %vm79_vm2, %v1618_v47 }
 0x20e   :  { %267 = vrot.lane.b32.xlu1 %v1618_v47, %s1465_s2 }
 0x27c   :  { %v270_v48 = vpop.permute.xlu1 %269 }
 0x27d   :  { %1320 = vmatprep.subr.msk.mxu1 %vm79_vm2, %v270_v48 }
 0x27e   :  { %1321 = vmatpush3.xpose.msk.msra.mxu1 %vm79_vm2, %v270_v48 }
 0x280   :  { %v268_v49 = vpop.permute.xlu1 %267 }
 0x281   :  { %1322 = vmatprep.subr.msk.mxu1 %vm79_vm2, %v268_v49 }
 0x282   :  { %1323 = vmatpush3.xpose.msk.msra.mxu1 %vm79_vm2, %v268_v49 }
 0x285   :  { %1325 = vmatmul.mubr.msk.f32.vlgmr.msra.gmra.mxu1 %vm79_vm2, %v1616_v45 }
 0x345   :  { %v1326_v53 = vpop.f32.mrf.mxu1 }
 0x346   :  { %v355_v56 = vmul.f32 0.25, %v1326_v53 }
 0x347   :  { %v345_v57 = vpop.f32.mrf.mxu1 }
 0x348   :  { %v354_v59 = vmul.f32 0.25, %v345_v57  ;;  %v357_v60 = vadd.f32 %v355_v56, %v1632_v55 }
 0x34a   :  { %v362_v61 = vsel %vm358_vm0, %v357_v60, -inf  ;;  %v356_v62 = vadd.f32 %v354_v59, %v1634_v58 }
 0x34b   :  { %363 = vmax.xlane.f32.xlu1 %v362_v61 }
 0x34c   :  { %v359_v63 = vsel %vm358_vm0, %v356_v62, -inf }
 0x34d   :  { %360 = vmax.xlane.f32.xlu0 %v359_v63 }
 0x35c   :  { %383 = vrot.lane.b32.xlu1 %v1616_v45, %s1467_s3 }
 0x360   :  { %476 = vrot.lane.b32.xlu1 %v1616_v45, %s1468_s18 }
 0x364   :  { %474 = vrot.lane.b32.xlu1 %v1618_v47, %s1468_s18 }
 0x368   :  { %472 = vrot.lane.b32.xlu1 %v1616_v45, %s1469_s19 }
 0x3d4   :  { %v364_v0 = vpop.xlane.xlu1 %363 }
 0x3d5   :  { %v366_v1 = vsub.f32 %v357_v60, %v364_v0 }
 0x3d6   :  { %v361_v2 = vpop.xlane.xlu0 %360 }
 0x3d7   :  { %v369_v3 = vmul.f32 1.442695, %v366_v1  ;;  %v365_v4 = vsub.f32 %v356_v62, %v361_v2 }
 0x3d8   :  { %v384_v5 = vpop.permute.xlu1 %383 }
 0x3d9   :  { %1408 = vpow2.f32 %v369_v3  ;;  %v367_v6 = vmul.f32 1.442695, %v365_v4  ;;  %1327 = vmatprep.subr.mxu1 %v384_v5 }
 0x3da   :  { %1328 = vmatpush3.msra.mxu1 %v384_v5 }
 0x3db   :  { %1410 = vpow2.f32 %v367_v6 }
 0x3dc   :  { %v477_v14 = vpop.permute.xlu1 %476 }
 0x3e0   :  { %v475_v20 = vpop.permute.xlu1 %474 }
 0x3e4   :  { %v473_v21 = vpop.permute.xlu1 %472 }
 0x3e6   :  { %v1409_v7 = vpop.eup %1408 }
 0x3e7   :  { %v374_v8 = vsel %vm358_vm0, %v1409_v7, 0.0 }
 0x3e8   :  { %v1411_v9 = vpop.eup %1410  ;;  %375 = vadd.xlane.f32.xlu0 %v374_v8 }
 0x3e9   :  { %v371_v10 = vsel %vm358_vm0, %v1411_v9, 0.0 }
 0x3ec   :  { %372 = vadd.xlane.f32.xlu0 %v371_v10 }
 0x402   :  { %381 = vrot.lane.b32.xlu0 %v1618_v47, %s1467_s3 }
 0x406   :  { %470 = vrot.lane.b32.xlu0 %v1618_v47, %s1469_s19 }
 0x471   :  { %v376_v11 = vpop.xlane.xlu0 %375 }
 0x472   :  { %1412 = vrcp.f32 %v376_v11 }
 0x475   :  { %v373_v12 = vpop.xlane.xlu0 %372 }
 0x476   :  { %1414 = vrcp.f32 %v373_v12 }
 0x479   :  { %v382_v13 = vpop.permute.xlu0 %381 }
 0x47a   :  { %1329 = vmatprep.subr.mxu1 %v382_v13 }
 0x47b   :  { %1330 = vmatpush3.msra.mxu1 %v382_v13 }
 0x47c   :  { %1334 = vmatprep.subr.msk.mxu1 %vm79_vm2, %v477_v14 }
 0x47d   :  { %v471_v19 = vpop.permute.xlu0 %470 }
 0x47f   :  { %v1413_v15 = vpop.eup %1412 }
 0x480   :  { %v380_v18 = vmul.f32 %v1413_v15, %v1409_v7 }
 0x483   :  { %v1415_v16 = vpop.eup %1414 }
 0x484   :  { %v379_v17 = vmul.f32 %v1415_v16, %v1411_v9 }
 0x486   :  { %1331 = vmatprep.mubr.msk.f32.mxu1 %vm358_vm0, %v379_v17 }
 0x487   :  { %1332 = vmatmul.mubr.msk.f32.vlgmr.msra.gmra.mxu1 %vm358_vm0, %v380_v18 }
 0x488   :  { %1335 = vmatpush3.xpose.msk.msra.mxu1 %vm79_vm2, %v477_v14  ;;  %1338 = vmatprep.mubr.msk.f32.mxu1 %vm79_vm2, %v471_v19 }
 0x489   :  { %1336 = vmatprep.subr.msk.mxu1 %vm79_vm2, %v475_v20 }
 0x48c   :  { %1337 = vmatpush3.xpose.msk.msra.mxu1 %vm79_vm2, %v475_v20 }
 0x48f   :  { %1339 = vmatmul.mubr.msk.f32.vlgmr.msra.gmra.mxu1 %vm79_vm2, %v473_v21 }
 0x547   :  { %v1333_v22 = vpop.f32.mrf.mxu1 }
 0x548   :  { %469 = vst.msk [vmem:[#allocation2 + $0x8] sm:$0xff] %vm79_vm2, %v1333_v22 }
 0x549   :  { %v459_v23 = vpop.f32.mrf.mxu1 }
 0x54a   :  { %468 = vst.msk [vmem:[#allocation2] sm:$0xff] %vm79_vm2, %v459_v23 }
 0x54f   :  { %v1340_v24 = vpop.f32.mrf.mxu1 }
 0x550   :  { %v562_v25 = vmul.f32 0.25, %v1340_v24 }
 0x551   :  { %v552_v26 = vpop.f32.mrf.mxu1 }
 0x552   :  { %v561_v27 = vmul.f32 0.25, %v552_v26  ;;  %v564_v28 = vadd.f32 %v562_v25, %v1632_v55 }
 0x554   :  { %v568_v29 = vsel %vm358_vm0, %v564_v28, -inf  ;;  %v563_v30 = vadd.f32 %v561_v27, %v1634_v58 }
 0x555   :  { %569 = vmax.xlane.f32.xlu1 %v568_v29 }
 0x556   :  { %v565_v31 = vsel %vm358_vm0, %v563_v30, -inf }
 0x557   :  { %566 = vmax.xlane.f32.xlu0 %v565_v31 }
 0x566   :  { %589 = vrot.lane.b32.xlu1 %v1616_v45, %s1470_s20 }
 0x56a   :  { %691 = vrot.lane.b32.xlu1 %v1616_v45, %s1471_s21 }
 0x56e   :  { %689 = vrot.lane.b32.xlu1 %v1618_v47, %s1471_s21 }
 0x572   :  { %687 = vrot.lane.b32.xlu1 %v1616_v45, %s1472_s22 }
 0x5de   :  { %v570_v32 = vpop.xlane.xlu1 %569 }
 0x5df   :  { %v572_v33 = vsub.f32 %v564_v28, %v570_v32 }
 0x5e0   :  { %v567_v34 = vpop.xlane.xlu0 %566 }
 0x5e1   :  { %v575_v35 = vmul.f32 1.442695, %v572_v33  ;;  %v571_v36 = vsub.f32 %v563_v30, %v567_v34 }
 0x5e2   :  { %v590_v37 = vpop.permute.xlu1 %589 }
 0x5e3   :  { %1416 = vpow2.f32 %v575_v35  ;;  %v573_v38 = vmul.f32 1.442695, %v571_v36  ;;  %1341 = vmatprep.subr.mxu1 %v590_v37 }
 0x5e4   :  { %1342 = vmatpush3.msra.mxu1 %v590_v37 }
 0x5e5   :  { %1418 = vpow2.f32 %v573_v38 }
 0x5e6   :  { %v692_v48 = vpop.permute.xlu1 %691 }
 0x5ea   :  { %v690_v54 = vpop.permute.xlu1 %689 }
 0x5ee   :  { %v688_v56 = vpop.permute.xlu1 %687 }
 0x5f0   :  { %v1417_v39 = vpop.eup %1416 }
 0x5f1   :  { %v580_v40 = vsel %vm358_vm0, %v1417_v39, 0.0 }
 0x5f2   :  { %v1419_v41 = vpop.eup %1418  ;;  %581 = vadd.xlane.f32.xlu0 %v580_v40 }
 0x5f3   :  { %v577_v42 = vsel %vm358_vm0, %v1419_v41, 0.0 }
 0x5f6   :  { %578 = vadd.xlane.f32.xlu0 %v577_v42 }
 0x60c   :  { %587 = vrot.lane.b32.xlu0 %v1618_v47, %s1470_s20 }
 0x610   :  { %685 = vrot.lane.b32.xlu0 %v1618_v47, %s1472_s22 }
 0x67b   :  { %v582_v43 = vpop.xlane.xlu0 %581 }
 0x67c   :  { %1420 = vrcp.f32 %v582_v43 }
 0x67f   :  { %v579_v44 = vpop.xlane.xlu0 %578 }
 0x680   :  { %1422 = vrcp.f32 %v579_v44 }
 0x683   :  { %v588_v46 = vpop.permute.xlu0 %587 }
 0x684   :  { %1343 = vmatprep.subr.mxu1 %v588_v46 }
 0x685   :  { %1344 = vmatpush3.msra.mxu1 %v588_v46 }
 0x686   :  { %1348 = vmatprep.subr.msk.mxu1 %vm79_vm2, %v692_v48 }
 0x687   :  { %v686_v53 = vpop.permute.xlu0 %685 }
 0x689   :  { %v1421_v49 = vpop.eup %1420 }
 0x68a   :  { %v586_v52 = vmul.f32 %v1421_v49, %v1417_v39 }
 0x68d   :  { %v1423_v50 = vpop.eup %1422 }
 0x68e   :  { %v585_v51 = vmul.f32 %v1423_v50, %v1419_v41 }
 0x690   :  { %1345 = vmatprep.mubr.msk.f32.mxu1 %vm358_vm0, %v585_v51 }
 0x691   :  { %1346 = vmatmul.mubr.msk.f32.vlgmr.msra.gmra.mxu1 %vm358_vm0, %v586_v52 }
 0x692   :  { %1349 = vmatpush3.xpose.msk.msra.mxu1 %vm79_vm2, %v692_v48  ;;  %1352 = vmatprep.mubr.msk.f32.mxu1 %vm79_vm2, %v686_v53 }
 0x693   :  { %1350 = vmatprep.subr.msk.mxu1 %vm79_vm2, %v690_v54 }
 0x696   :  { %1351 = vmatpush3.xpose.msk.msra.mxu1 %vm79_vm2, %v690_v54 }
 0x699   :  { %1353 = vmatmul.mubr.msk.f32.vlgmr.msra.gmra.mxu1 %vm79_vm2, %v688_v56 }
 0x751   :  { %v1678_v57 = vpop.f32.mrf.mxu1 }
 0x753   :  { %v1680_v59 = vpop.f32.mrf.mxu1 }
 0x759   :  { %v1354_v60 = vpop.f32.mrf.mxu1 }
 0x75a   :  { %v777_v61 = vmul.f32 0.25, %v1354_v60  ;;  %v1118_v60 = vld [vmem:[%s1745_s4 + $0x8] sm:$0xff] }
 0x75b   :  { %v767_v62 = vpop.f32.mrf.mxu1 }
 0x75c   :  { %v776_v63 = vmul.f32 0.25, %v767_v62  ;;  %v779_v0 = vadd.f32 %v777_v61, %v1632_v55  ;;  %v1117_v61 = vld [vmem:[%s1745_s4] sm:$0xff] }
 0x75e   :  { %v783_v1 = vsel %vm358_vm0, %v779_v0, -inf  ;;  %v778_v2 = vadd.f32 %v776_v63, %v1634_v58 }
 0x75f   :  { %784 = vmax.xlane.f32.xlu1 %v783_v1 }
 0x760   :  { %v780_v3 = vsel %vm358_vm0, %v778_v2, -inf }
 0x761   :  { %781 = vmax.xlane.f32.xlu0 %v780_v3 }
 0x770   :  { %804 = vrot.lane.b32.xlu1 %v1616_v45, %s1473_s23 }
 0x774   :  { %906 = vrot.lane.b32.xlu1 %v1616_v45, %s1474_s24 }
 0x778   :  { %904 = vrot.lane.b32.xlu1 %v1618_v47, %s1474_s24 }
 0x77c   :  { %902 = vrot.lane.b32.xlu1 %v1616_v45, %s1475_s25 }
 0x7e8   :  { %v785_v4 = vpop.xlane.xlu1 %784 }
 0x7e9   :  { %v787_v5 = vsub.f32 %v779_v0, %v785_v4  ;;  %v1262_v4 = vld [vmem:[%s1746_s5] ss:$0 sm:$0xff] }
 0x7ea   :  { %v782_v6 = vpop.xlane.xlu0 %781 }
 0x7eb   :  { %v790_v7 = vmul.f32 1.442695, %v787_v5  ;;  %v786_v8 = vsub.f32 %v778_v2, %v782_v6 }
 0x7ec   :  { %v805_v9 = vpop.permute.xlu1 %804 }
 0x7ed   :  { %1424 = vpow2.f32 %v790_v7  ;;  %v788_v10 = vmul.f32 1.442695, %v786_v8  ;;  %1355 = vmatprep.subr.mxu1 %v805_v9 }
 0x7ee   :  { %1356 = vmatpush3.msra.mxu1 %v805_v9 }
 0x7ef   :  { %1426 = vpow2.f32 %v788_v10 }
 0x7f0   :  { %v907_v18 = vpop.permute.xlu1 %906 }
 0x7f4   :  { %v905_v24 = vpop.permute.xlu1 %904 }
 0x7f8   :  { %v903_v25 = vpop.permute.xlu1 %902 }
 0x7fa   :  { %v1425_v11 = vpop.eup %1424 }
 0x7fb   :  { %v795_v12 = vsel %vm358_vm0, %v1425_v11, 0.0 }
 0x7fc   :  { %v1427_v13 = vpop.eup %1426  ;;  %796 = vadd.xlane.f32.xlu0 %v795_v12 }
 0x7fd   :  { %v792_v14 = vsel %vm358_vm0, %v1427_v13, 0.0 }
 0x800   :  { %793 = vadd.xlane.f32.xlu0 %v792_v14 }
 0x816   :  { %802 = vrot.lane.b32.xlu0 %v1618_v47, %s1473_s23 }
 0x81a   :  { %900 = vrot.lane.b32.xlu0 %v1618_v47, %s1475_s25 }
 0x885   :  { %v797_v15 = vpop.xlane.xlu0 %796 }
 0x886   :  { %1428 = vrcp.f32 %v797_v15 }
 0x889   :  { %v794_v16 = vpop.xlane.xlu0 %793 }
 0x88a   :  { %1430 = vrcp.f32 %v794_v16 }
 0x88d   :  { %v803_v17 = vpop.permute.xlu0 %802 }
 0x88e   :  { %1357 = vmatprep.subr.mxu1 %v803_v17 }
 0x88f   :  { %1358 = vmatpush3.msra.mxu1 %v803_v17 }
 0x890   :  { %1362 = vmatprep.subr.msk.mxu1 %vm79_vm2, %v907_v18 }
 0x891   :  { %v901_v23 = vpop.permute.xlu0 %900 }
 0x893   :  { %v1429_v19 = vpop.eup %1428 }
 0x894   :  { %v801_v22 = vmul.f32 %v1429_v19, %v1425_v11 }
 0x897   :  { %v1431_v20 = vpop.eup %1430 }
 0x898   :  { %v800_v21 = vmul.f32 %v1431_v20, %v1427_v13 }
 0x89a   :  { %1359 = vmatprep.mubr.msk.f32.mxu1 %vm358_vm0, %v800_v21 }
 0x89b   :  { %1360 = vmatmul.mubr.msk.f32.vlgmr.msra.gmra.mxu1 %vm358_vm0, %v801_v22 }
 0x89c   :  { %1363 = vmatpush3.xpose.msk.msra.mxu1 %vm79_vm2, %v907_v18  ;;  %1366 = vmatprep.mubr.msk.f32.mxu1 %vm79_vm2, %v901_v23 }
 0x89d   :  { %1364 = vmatprep.subr.msk.mxu1 %vm79_vm2, %v905_v24 }
 0x8a0   :  { %1365 = vmatpush3.xpose.msk.msra.mxu1 %vm79_vm2, %v905_v24 }
 0x8a3   :  { %1367 = vmatmul.mubr.msk.f32.vlgmr.msra.gmra.mxu1 %vm79_vm2, %v903_v25  ;;  %vm897_vm2 = vcmask 195712  }
 0x95b   :  { %v1361_v26 = vpop.f32.mrf.mxu1 }
 0x95d   :  { %v880_v27 = vpop.f32.mrf.mxu1 }
 0x963   :  { %v1368_v28 = vpop.f32.mrf.mxu1 }
 0x964   :  { %v992_v29 = vmul.f32 0.25, %v1368_v28 }
 0x965   :  { %v982_v30 = vpop.f32.mrf.mxu1 }
 0x966   :  { %v991_v31 = vmul.f32 0.25, %v982_v30  ;;  %v994_v32 = vadd.f32 %v992_v29, %v1632_v55 }
 0x968   :  { %v993_v33 = vadd.f32 %v991_v31, %v1634_v58  ;;  %v998_v34 = vsel %vm358_vm0, %v994_v32, -inf }
 0x969   :  { %999 = vmax.xlane.f32.xlu1 %v998_v34 }
 0x96a   :  { %v995_v35 = vsel %vm358_vm0, %v993_v33, -inf }
 0x96b   :  { %996 = vmax.xlane.f32.xlu0 %v995_v35 }
 0x97a   :  { %1019 = vrot.lane.b32.xlu1 %v1616_v45, %s1476_s26 }
 0x97e   :  { %676 = vrot.lane.b32.xlu1 %v1680_v59, %s1477_s27  ;;  %v1119_v59 = vld [vmem:[%s1745_s4 + $0x10] sm:$0xff] }
 0x982   :  { %678 = vrot.lane.b32.xlu1 %v1678_v57, %s1477_s27 }
 0x986   :  { %893 = vrot.lane.b32.xlu1 %v1361_v26, %s1478_s28 }
 0x9f2   :  { %v1000_v55 = vpop.xlane.xlu1 %999 }
 0x9f3   :  { %v1002_v58 = vsub.f32 %v994_v32, %v1000_v55 }
 0x9f4   :  { %v997_v36 = vpop.xlane.xlu0 %996 }
 0x9f5   :  { %v1005_v37 = vmul.f32 1.442695, %v1002_v58  ;;  %v1001_v38 = vsub.f32 %v993_v33, %v997_v36 }
 0x9f6   :  { %v1020_v39 = vpop.permute.xlu1 %1019 }
 0x9f7   :  { %1432 = vpow2.f32 %v1005_v37  ;;  %v1003_v40 = vmul.f32 1.442695, %v1001_v38  ;;  %1369 = vmatprep.subr.mxu0 %v1020_v39 }
 0x9f8   :  { %1370 = vmatpush3.msra.mxu0 %v1020_v39 }
 0x9f9   :  { %1434 = vpow2.f32 %v1003_v40 }
 0x9fa   :  { %v677_v45 = vpop.permute.xlu1 %676 }
 0x9fb   :  { %683 = vst.msk [vmem:[#allocation2] sm:$0xff] %vm682_vm1, %v677_v45 }
 0x9fe   :  { %v679_v41 = vpop.permute.xlu1 %678 }
 0x9ff   :  { %684 = vst.msk [vmem:[#allocation2 + $0x8] sm:$0xff] %vm682_vm1, %v679_v41 }
 0xa02   :  { %v894_v42 = vpop.permute.xlu1 %893 }
 0xa03   :  { %899 = vst.msk [vmem:[#allocation2 + $0x8] sm:$0xff] %vm897_vm2, %v894_v42 }
 0xa04   :  { %v1433_v43 = vpop.eup %1432 }
 0xa05   :  { %v1010_v44 = vsel %vm358_vm0, %v1433_v43, 0.0 }
 0xa06   :  { %v1435_v46 = vpop.eup %1434  ;;  %1011 = vadd.xlane.f32.xlu0 %v1010_v44 }
 0xa07   :  { %v1007_v48 = vsel %vm358_vm0, %v1435_v46, 0.0 }
 0xa0a   :  { %1008 = vadd.xlane.f32.xlu0 %v1007_v48 }
 0xa20   :  { %1017 = vrot.lane.b32.xlu0 %v1618_v47, %s1476_s26  ;;  %v1120_v47 = vld [vmem:[%s1745_s4 + $0x18] sm:$0xff] }
 0xa24   :  { %891 = vrot.lane.b32.xlu0 %v880_v27, %s1478_s28 }
 0xa8f   :  { %v1012_v49 = vpop.xlane.xlu0 %1011 }
 0xa90   :  { %1436 = vrcp.f32 %v1012_v49 }
 0xa93   :  { %v1009_v50 = vpop.xlane.xlu0 %1008 }
 0xa94   :  { %1438 = vrcp.f32 %v1009_v50 }
 0xa97   :  { %v1018_v51 = vpop.permute.xlu0 %1017 }
 0xa98   :  { %1371 = vmatprep.subr.mxu0 %v1018_v51 }
 0xa99   :  { %1372 = vmatpush3.msra.mxu0 %v1018_v51 }
 0xa9a   :  { %1376 = vmatprep.subr.mxu0 %v1120_v47 }
 0xa9b   :  { %v892_v52 = vpop.permute.xlu0 %891 }
 0xa9c   :  { %898 = vst.msk [vmem:[#allocation2] sm:$0xff] %vm897_vm2, %v892_v52 }
 0xa9d   :  { %v1437_v53 = vpop.eup %1436 }
 0xa9e   :  { %v1016_v57 = vmul.f32 %v1437_v53, %v1433_v43 }
 0xaa1   :  { %v1439_v54 = vpop.eup %1438 }
 0xaa2   :  { %v1015_v56 = vmul.f32 %v1439_v54, %v1435_v46 }
 0xaa4   :  { %1373 = vmatprep.mubr.msk.f32.mxu0 %vm358_vm0, %v1015_v56 }
 0xaa5   :  { %1374 = vmatmul.mubr.msk.f32.vlgmr.msra.gmra.mxu0 %vm358_vm0, %v1016_v57 }
 0xaa6   :  { %1377 = vmatpush3.msra.mxu0 %v1120_v47 }
 0xaa7   :  { %1378 = vmatprep.subr.mxu0 %v1119_v59 }
 0xaa8   :  { %1379 = vmatpush3.msra.mxu0 %v1119_v59 }
 0xaa9   :  { %1380 = vmatprep.subr.mxu0 %v1118_v60 }
 0xaaa   :  { %1381 = vmatpush3.msra.mxu0 %v1118_v60 }
 0xaab   :  { %1382 = vmatprep.subr.mxu0 %v1117_v61 }
 0xaac   :  { %1383 = vmatpush3.msra.mxu0 %v1117_v61 }
 0xb65   :  { %v1375_v62 = vpop.f32.mrf.mxu0 }
 0xb66   :  { %1108 = vrot.lane.b32.xlu1 %v1375_v62, %s1479_s12 }
 0xb67   :  { %v1095_v63 = vpop.f32.mrf.mxu0 }
 0xb68   :  { %1106 = vrot.lane.b32.xlu0 %v1095_v63, %s1479_s12 }
 0xbd8   :  { %v1109_v0 = vpop.permute.xlu1 %1108 }
 0xbd9   :  { %1114 = vst.msk [vmem:[#allocation2 + $0x8] sm:$0xff] %vm1112_vm3, %v1109_v0 }
 0xbda   :  { %v1107_v1 = vpop.permute.xlu0 %1106 }
 0xbdb   :  { %1113 = vst.msk [vmem:[#allocation2] sm:$0xff] %vm1112_vm3, %v1107_v1 }
 0xbe0   :  { %v1116_v3 = vld [vmem:[#allocation2 + $0x8] sm:$0xff] }
 0xbe2   :  { %v1115_v2 = vld [vmem:[#allocation2] sm:$0xff] }
 0xbe3   :  { %1384 = vmatprep.mubr.msk.f32.mxu0 %vm172_vm9, %v1115_v2 }
 0xbe4   :  { %1385 = vmatmul.mubr.msk.f32.vlgmr.msra.gmra.mxu0 %vm172_vm9, %v1116_v3 }
 0xca4   :  { %v1386_v5 = vpop.f32.mrf.mxu0 }
 0xca5   :  { %v1206_v6 = vadd.f32 %v1386_v5, %v1262_v4 }
 0xca6   :  { %v1200_v7 = vpop.f32.mrf.mxu0 }
 0xca7   :  { %1210 = vst [vmem:[#allocation3 + $0x8] sm:$0xff] %v1206_v6  ;;  %v1201_v8 = vadd.f32 %v1262_v4, %v1200_v7 }
 0xca9   :  { %1209 = vst [vmem:[#allocation3] sm:$0xff] %v1201_v8 }
 0xcaa   :  { %1451 = shalt.err (!%p1448_p4)
}
 0xcab   :  { %s1481_s16 = smov 128  }
 0xcac   :  { %1222 = dma.vmem_to_hbm [thread:$0]  %s1217_s14, 256, %s1747_s6, [#allocation4], %s1481_s16, %s1481_s16, %s1477_s27  }
 0xcad   :  { %1460 = dma.done.wait [#allocation4], 256  }
 0xcae   :  { %1461 = vsyncadd [#allocation4], 4294967040 }
 0xcaf   :  { %1226 = vsyncpa [#allocation4], 1 }

</bundles_post_ra>
